<compile_context>
chip_gen: v5e
topology: v5e:2x2
jax: 0.10.0
libtpu: 0.0.40
codegen_flags: <defaults>
</compile_context>

<pallas_src>
import functools

import jax
import jax.numpy as jnp
from jax.experimental import pallas as pl
from jax.experimental.pallas import tpu as pltpu

_MIB = 1024 * 1024


def _channel_shuffle_kernel(x_ref, o_ref, *, groups: int):
    # x_ref / o_ref: (BT, C, TL) VMEM tiles. Channel permute = sublane permutation.
    bt, channels, tl = x_ref.shape
    cpg = channels // groups
    x = x_ref[...]                                                   # (BT, C, TL)
    y = jnp.transpose(x.reshape(bt, groups, cpg, tl), (0, 2, 1, 3))  # (BT, cpg, groups, TL)
    o_ref[...] = y.reshape(bt, channels, tl)


def _reference_channel_shuffle_1d(x: jax.Array, groups: int) -> jax.Array:
    # Pure-JAX reference mirroring the PyTorch module exactly.
    batch, channels, seq_len = x.shape
    cpg = channels // groups
    y = x.reshape(batch, groups, cpg, seq_len)
    y = jnp.transpose(y, (0, 2, 1, 3))
    return y.reshape(batch, channels, seq_len)


def _vmem_budget():
    """Returns (block_target_bytes, vmem_limit_bytes, vmem_capacity, multi_core_hint)."""
    vmem_cap = 0
    try:
        vmem_cap = int(pltpu.get_tpu_info().vmem_capacity_bytes)
    except Exception:
        vmem_cap = 0
    if vmem_cap <= 0:
        vmem_cap = 64 * _MIB          # unknown -> assume the smallest (v7x-like) VMEM
    if vmem_cap <= 72 * _MIB:
        # v7x-like: 64 MiB VMEM per TensorCore, 2 TCs per chip.
        return 6 * _MIB, 40 * _MIB, vmem_cap, True
    # v5e / v6e-like: 128 MiB VMEM, single TensorCore.
    return 8 * _MIB, 64 * _MIB, vmem_cap, False


def _largest_divisor_le(n: int, cap: int) -> int:
    cap = max(1, min(n, cap))
    for d in range(cap, 0, -1):
        if n % d == 0:
            return d
    return 1


def _pick_tiles(batch, channels, seq_len, itemsize):
    """Returns (batch_tile, lane_tile, vmem_limit_bytes) or None if Pallas shouldn't run."""
    block_target, vmem_limit, vmem_cap, multi_core = _vmem_budget()
    row_bytes = channels * seq_len * itemsize

    # Lane (seq) tile: full length if it fits the block budget, else the largest
    # multiple of 128 that does (pure HBM-bandwidth kernel -> biggest block wins).
    if row_bytes <= block_target:
        tl = seq_len
    else:
        tl = min(seq_len, max(128, (block_target // (channels * itemsize)) // 128 * 128))

    # Fold several batch rows into one block when a single row is small.
    bt = 1
    if tl == seq_len and batch > 1:
        bt = _largest_divisor_le(batch, block_target // max(1, row_bytes))

    # Pipeline footprint: input + output, each double-buffered, plus slack.
    needed = 4 * bt * channels * tl * itemsize + 2 * _MIB
    if needed > vmem_limit:
        headroom = int(0.85 * vmem_cap)
        if needed > headroom:
            return None  # untiled channel axis alone overflows VMEM; caller falls back
        vmem_limit = needed

    # Keep both TensorCores busy on dual-core chips when the grid collapses to 1 step.
    if (multi_core and pl.cdiv(batch, bt) * pl.cdiv(seq_len, tl) == 1
            and batch * row_bytes >= 2 * _MIB):
        if seq_len >= 256:
            tl = max(128, pl.cdiv(pl.cdiv(seq_len, 2), 128) * 128)
        elif bt > 1:
            bt = _largest_divisor_le(batch, max(1, bt // 2))

    return bt, tl, vmem_limit


def channel_shuffle_1d(x: jax.Array, groups: int) -> jax.Array:
    """Pallas implementation of ChannelShuffle1d.forward for (batch, channels, seq_len)."""
    batch, channels, seq_len = x.shape
    assert channels % groups == 0

    itemsize = jnp.dtype(x.dtype).itemsize

    # Tiny lane extents would lower to masked partial stores and the op is a few KiB;
    # XLA's fused transpose is as fast, so skip the Pallas call entirely.
    if seq_len < 128:
        return _reference_channel_shuffle_1d(x, groups)

    tiles = _pick_tiles(batch, channels, seq_len, itemsize)
    if tiles is None:
        # TODO(synk): tile the (very large) channel axis per group instead of falling back.
        return _reference_channel_shuffle_1d(x, groups)
    bt, tl, vmem_limit = tiles

    grid = (pl.cdiv(batch, bt), pl.cdiv(seq_len, tl))
    kernel = functools.partial(_channel_shuffle_kernel, groups=groups)

    return pl.pallas_call(
        kernel,
        out_shape=jax.ShapeDtypeStruct((batch, channels, seq_len), x.dtype),
        grid_spec=pl.GridSpec(
            grid=grid,
            in_specs=[pl.BlockSpec((bt, channels, tl), lambda b, l: (b, 0, l))],
            out_specs=pl.BlockSpec((bt, channels, tl), lambda b, l: (b, 0, l)),
        ),
        compiler_params=pltpu.CompilerParams(
            dimension_semantics=("parallel", "parallel"),
            vmem_limit_bytes=int(vmem_limit),
        ),
        cost_estimate=pl.CostEstimate(
            flops=0,
            transcendentals=0,
            bytes_accessed=2 * batch * channels * seq_len * itemsize,
        ),
    )(x)


if __name__ == "__main__":
    key = jax.random.PRNGKey(0)
    key_a, key_b = jax.random.split(key)

    # Case 1: small Jasper-like shape (exercises batch folding, groups=2).
    batch, channels, seq_len, groups = 2, 8, 256, 2
    x = jax.random.normal(key_a, (batch, channels, seq_len), dtype=jnp.float32)
    out = jax.block_until_ready(channel_shuffle_1d(x, groups))
    ref = _reference_channel_shuffle_1d(x, groups)
    assert out.shape == ref.shape and out.dtype == ref.dtype
    assert jnp.array_equal(out, ref), "Pallas channel shuffle mismatch vs reference (case 1)"

    # Case 2: odd batch folding (bt=3) and groups=4.
    x2 = jax.random.normal(key_b, (3, 16, 384), dtype=jnp.float32)
    out2 = jax.block_until_ready(channel_shuffle_1d(x2, 4))
    ref2 = _reference_channel_shuffle_1d(x2, 4)
    assert jnp.array_equal(out2, ref2), "Pallas channel shuffle mismatch vs reference (case 2)"

    print("KERNEL_OK")
</pallas_src>

<mosaic_0001>
module attributes {stable_mosaic.version = 11 : i64} {
  func.func @_channel_shuffle_kernel(%arg0: i32, %arg1: i32, %arg2: memref<2x8x256xf32, #tpu.memory_space<vmem>>, %arg3: memref<2x8x256xf32, #tpu.memory_space<vmem>>) attributes {dimension_semantics = [#tpu.dimension_semantics<parallel>, #tpu.dimension_semantics<parallel>], iteration_bounds = array<i64: 1, 1>, scalar_prefetch = 0 : i64, scratch_operands = 0 : i64, tpu.core_type = #tpu.core_type<tc>, window_params = [{transform_indices = @transform_0, window_bounds = array<i64: 2, 8, 256>}, {transform_indices = @transform_1, window_bounds = array<i64: 2, 8, 256>}]} {
    %c0 = arith.constant 0 : index
    %c0_0 = arith.constant 0 : index
    %c0_1 = arith.constant 0 : index
    %0 = vector.load %arg2[%c0, %c0_0, %c0_1] : memref<2x8x256xf32, #tpu.memory_space<vmem>>, vector<2x8x256xf32>
    %1 = vector.shape_cast %0 : vector<2x8x256xf32> to vector<2x2x4x256xf32>
    %2 = tpu.transpose %1, [0, 2, 1, 3] : vector<2x2x4x256xf32> -> vector<2x4x2x256xf32>
    %3 = vector.shape_cast %2 : vector<2x4x2x256xf32> to vector<2x8x256xf32>
    %c0_2 = arith.constant 0 : index
    %c0_3 = arith.constant 0 : index
    %c0_4 = arith.constant 0 : index
    %4 = vector.load %arg3[%c0_2, %c0_3, %c0_4] : memref<2x8x256xf32, #tpu.memory_space<vmem>>, vector<2x8x256xf32>
    tpu.vector_store %arg3[%c0_2, %c0_3, %c0_4], %3 {strides = array<i32>} : memref<2x8x256xf32, #tpu.memory_space<vmem>>, vector<2x8x256xf32>,
    return
  }
  func.func @transform_0(%arg0: i32, %arg1: i32) -> (i32, i32, i32) {
    %c0_i32 = arith.constant 0 : i32
    %c0_i32_0 = arith.constant 0 : i32
    return %arg0, %c0_i32, %arg1 : i32, i32, i32
  }
  func.func @transform_1(%arg0: i32, %arg1: i32) -> (i32, i32, i32) {
    %c0_i32 = arith.constant 0 : i32
    %c0_i32_0 = arith.constant 0 : i32
    return %arg0, %c0_i32, %arg1 : i32, i32, i32
  }
}

</mosaic_0001>

<bundles_post_ra>
// kernel: tpu_custom_call.1
= control target key start
LH: loop header
LB: loop body
LE: loop exit
PB: predicated region body
PF: predicated region fallthrough
CT: control target
= control target key end

     0   :  { %6 = vsyncpa [#allocation3], 0  ;;  %s340_s0 = inlined_call_operand.hbm [shape: f32[2,8,256], index: 0, kind: input, shape index: {}]   ;;  %s341_s1 = inlined_call_operand.hbm [shape: f32[2,8,256], index: 1, kind: output, shape index: {}]  }
   0x1   :  { %7 = vsyncpa [#allocation4], 0  ;;  %s12_s8 = sshll.u32 %s340_s0, 4  ;;  %s280_s9 = smov [#allocation2]   ;;  %s13_s8 = int_to_ptr.hbm [resolvable:$true] %s12_s8 }
   0x2   :  { %s14_s10 = sshll.u32 %s280_s9, 4  ;;  %s281_s11 = smov 256   ;;  %s15_s10 = int_to_ptr.vmem [resolvable:$true] %s14_s10 }
   0x3   :  { %s282_s12 = smov 16  }
   0x4   :  { %20 = dma.hbm_to_vmem [thread:$0]  %s13_s8, 512, %s15_s10, [#allocation3], %s281_s11, %s281_s11, %s282_s12  }
   0x5   :  { %276 = dma.done.wait [#allocation3], 512  }
   0x6   :  { %277 = vsyncadd [#allocation3], 4294966784  ;;  %v283_v0 = vmov 1983009808   ;;  %v25_v2 = vld [vmem:[#allocation2] sm:$0xff]  ;;  %v26_v3 = vld [vmem:[#allocation2 + $0x8] sm:$0xff] }
   0x7   :  { %v50_v1 = vunpack.c.l.s4 %v283_v0  ;;  %vm35_vm0 = vcmask 1043456   ;;  %v33_v5 = vrot.slane %v26_v3, 4  ;;  %v284_v6 = vmov 1934713408   ;;  %v28_v8 = vld [vmem:[#allocation2 + $0x18] sm:$0xff]  ;;  %v27_v9 = vld [vmem:[#allocation2 + $0x10] sm:$0xff] }
   0x8   :  { %v72_v7 = vunpack.c.l.s4 %v284_v6  ;;  %v34_v10 = vrot.slane %v28_v8, 4  ;;  %vm47_vm1 = vcmask 1047556   ;;  %vm167_vm2 = vcmask 1041408   ;;  %s285_s0 = smov [#allocation5]   ;;  %s209_s16 = sshll.u32 %s341_s1, 4  ;;  %s210_s16 = int_to_ptr.hbm [resolvable:$true] %s209_s16 }
   0x9   :  { %v51_v4 = vunpack.c.0.s8 %v50_v1  ;;  %v36_v11 = vsel %vm35_vm0, %v25_v2, %v33_v5  ;;  %v37_v12 = vsel %vm35_vm0, %v33_v5, %v25_v2  ;;  %s207_s13 = sshll.u32 %s285_s0, 4  ;;  %s208_s13 = int_to_ptr.vmem [resolvable:$true] %s207_s13 }
   0xa   :  { %v38_v13 = vrot.slane %v37_v12, 4  ;;  %v46_v14 = vrot.slane %v36_v11, 4  ;;  %v39_v16 = vsel %vm35_vm0, %v27_v9, %v34_v10  ;;  %v73_v17 = vunpack.c.0.s8 %v72_v7 }
   0xb   :  { %v52_v15 = vperm.slane %v36_v11, %v51_v4  ;;  %v40_v18 = vsel %vm35_vm0, %v34_v10, %v27_v9  ;;  %v99_v19 = vrot.slane %v39_v16, 4  ;;  %v104_v20 = vperm.slane %v39_v16, %v51_v4 }
   0xc   :  { %v48_v21 = vsel %vm47_vm1, 0.0, %v46_v14  ;;  %v57_v22 = vrot.slane %v38_v13, 4  ;;  %v62_v23 = vperm.slane %v38_v13, %v51_v4  ;;  %v41_v26 = vrot.slane %v40_v18, 4 }
   0xd   :  { %v69_v24 = vrot.slane %v52_v15, 4  ;;  %v56_v25 = vperm.slane %v48_v21, %v51_v4  ;;  %v100_v27 = vsel %vm47_vm1, 0.0, %v99_v19  ;;  %v121_v28 = vrot.slane %v104_v20, 4 }
   0xe   :  { %v58_v29 = vsel %vm47_vm1, 0.0, %v57_v22  ;;  %v67_v30 = vrot.slane %v62_v23, 4  ;;  %v108_v32 = vperm.slane %v100_v27, %v51_v4  ;;  %v109_v36 = vrot.slane %v41_v26, 4 }
   0xf   :  { %v70_v31 = vsel %vm47_vm1, %v62_v23, %v69_v24  ;;  %v66_v33 = vperm.slane %v58_v29, %v51_v4  ;;  %v81_v35 = vrot.slane %v56_v25, 4  ;;  %v114_v38 = vperm.slane %v41_v26, %v51_v4 }
  0x10   :  { %v78_v34 = vperm.slane %v70_v31, %v73_v17  ;;  %v68_v37 = vsel %vm47_vm1, %v67_v30, %v52_v15  ;;  %v133_v39 = vrot.slane %v108_v32, 4  ;;  %v110_v45 = vsel %vm47_vm1, 0.0, %v109_v36 }
  0x11   :  { %v74_v40 = vperm.slane %v68_v37, %v73_v17  ;;  %v79_v41 = vrot.slane %v66_v33, 4  ;;  %v82_v42 = vsel %vm47_vm1, %v66_v33, %v81_v35  ;;  %v119_v46 = vrot.slane %v114_v38, 4 }
  0x12   :  { %v97_v43 = vrot.slane %v78_v34, 4  ;;  %v90_v44 = vperm.slane %v82_v42, %v73_v17  ;;  %v122_v47 = vsel %vm47_vm1, %v114_v38, %v121_v28  ;;  %v118_v50 = vperm.slane %v110_v45, %v51_v4 }
  0x13   :  { %v80_v48 = vsel %vm47_vm1, %v79_v41, %v56_v25  ;;  %v93_v49 = vrot.slane %v74_v40, 4  ;;  %v130_v51 = vperm.slane %v122_v47, %v73_v17  ;;  %v120_v55 = vsel %vm47_vm1, %v119_v46, %v104_v20 }
  0x14   :  { %v86_v52 = vperm.slane %v80_v48, %v73_v17  ;;  %v95_v53 = vrot.slane %v90_v44, 4  ;;  %v98_v54 = vsel %vm47_vm1, %v90_v44, %v97_v43  ;;  %v126_v57 = vperm.slane %v120_v55, %v73_v17 }
  0x15   :  { %v162_v56 = vrot.slane %v98_v54, 2  ;;  %v131_v58 = vrot.slane %v118_v50, 4  ;;  %v134_v59 = vsel %vm47_vm1, %v118_v50, %v133_v39  ;;  %v149_v11 = vrot.slane %v130_v51, 4 }
  0x16   :  { %v91_v60 = vrot.slane %v86_v52, 4  ;;  %v94_v61 = vsel %vm47_vm1, %v86_v52, %v93_v49  ;;  %v96_v62 = vsel %vm47_vm1, %v95_v53, %v78_v34  ;;  %v142_v63 = vperm.slane %v134_v59, %v73_v17 }
  0x17   :  { %v160_v0 = vrot.slane %v94_v61, 2  ;;  %v161_v1 = vrot.slane %v96_v62, 2  ;;  %v171_v2 = vsel %vm167_vm2, %v98_v54, %v162_v56  ;;  %v132_v3 = vsel %vm47_vm1, %v131_v58, %v108_v32 }
  0x18   :  { %v92_v4 = vsel %vm47_vm1, %v91_v60, %v74_v40  ;;  %182 = vst [vmem:[#allocation1 + $0x3] ss:$4 sm:$0xff] %v171_v2  ;;  %v138_v5 = vperm.slane %v132_v3, %v73_v17  ;;  %v145_v6 = vrot.slane %v126_v57, 4  ;;  %v147_v7 = vrot.slane %v142_v63, 4 }
  0x19   :  { %v159_v8 = vrot.slane %v92_v4, 2  ;;  %v169_v9 = vsel %vm167_vm2, %v94_v61, %v160_v0  ;;  %v170_v10 = vsel %vm167_vm2, %v96_v62, %v161_v1  ;;  %v150_v17 = vsel %vm47_vm1, %v142_v63, %v149_v11 }
  0x1a   :  { %178 = vst [vmem:[#allocation1 + $0x1] ss:$4 sm:$0xff] %v169_v9  ;;  %v143_v12 = vrot.slane %v138_v5, 4  ;;  %v146_v13 = vsel %vm47_vm1, %v138_v5, %v145_v6  ;;  %v148_v14 = vsel %vm47_vm1, %v147_v7, %v130_v51  ;;  %v166_v20 = vrot.slane %v150_v17, 2 }
  0x1b   :  { %v168_v15 = vsel %vm167_vm2, %v92_v4, %v159_v8  ;;  %180 = vst [vmem:[#allocation1 + $0x2] ss:$4 sm:$0xff] %v170_v10  ;;  %v164_v16 = vrot.slane %v146_v13, 2  ;;  %v165_v18 = vrot.slane %v148_v14, 2 }
  0x1c   :  { %176 = vst [vmem:[#allocation1] ss:$4 sm:$0xff] %v168_v15  ;;  %v144_v19 = vsel %vm47_vm1, %v143_v12, %v126_v57  ;;  %v175_v24 = vsel %vm167_vm2, %v150_v17, %v166_v20 }
  0x1d   :  { %v163_v21 = vrot.slane %v144_v19, 2  ;;  %v173_v22 = vsel %vm167_vm2, %v146_v13, %v164_v16  ;;  %v174_v23 = vsel %vm167_vm2, %v148_v14, %v165_v18  ;;  %192 = vst [vmem:[#allocation1 + $0x23] ss:$4 sm:$0xff] %v175_v24 }
  0x1e   :  { %188 = vst [vmem:[#allocation1 + $0x21] ss:$4 sm:$0xff] %v173_v22 }
  0x1f   :  { %v172_v25 = vsel %vm167_vm2, %v144_v19, %v163_v21  ;;  %190 = vst [vmem:[#allocation1 + $0x22] ss:$4 sm:$0xff] %v174_v23 }
  0x20   :  { %186 = vst [vmem:[#allocation1 + $0x20] ss:$4 sm:$0xff] %v172_v25 }
  0x23   :  { %v183_v26 = vld.sshfl [vmem:[#allocation1] sm:$0xff pattern:$0x73625140]  ;;  %v184_v27 = vld.sshfl [vmem:[#allocation1 + $0x8] sm:$0xff pattern:$0x73625140] }
  0x24   :  { %199 = vst [vmem:[#allocation5] sm:$0xff] %v183_v26 }
  0x25   :  { %200 = vst [vmem:[#allocation5 + $0x8] sm:$0xff] %v184_v27 }
  0x27   :  { %v193_v28 = vld.sshfl [vmem:[#allocation1 + $0x20] sm:$0xff pattern:$0x73625140]  ;;  %v194_v29 = vld.sshfl [vmem:[#allocation1 + $0x28] sm:$0xff pattern:$0x73625140] }
  0x28   :  { %201 = vst [vmem:[#allocation5 + $0x10] sm:$0xff] %v193_v28 }
  0x29   :  { %202 = vst [vmem:[#allocation5 + $0x18] sm:$0xff] %v194_v29 }
  0x2a   :  { %215 = dma.vmem_to_hbm [thread:$0]  %s208_s13, 512, %s210_s16, [#allocation4], %s281_s11, %s281_s11, %s282_s12  }
  0x2b   :  { %278 = dma.done.wait [#allocation4], 512  }
  0x2c   :  { %279 = vsyncadd [#allocation4], 4294966784 }
  0x2d   :  { %220 = vsyncpa [#allocation3], 1 }
  0x2e   :  { %221 = vsyncpa [#allocation4], 1 }

</bundles_post_ra>
